<compile_context>
chip_gen: v5e
topology: v5e:2x2
jax: 0.10.0
libtpu: 0.0.40
codegen_flags: <defaults>
</compile_context>

<pallas_src>
import jax
import jax.numpy as jnp
from jax.experimental import pallas as pl
from jax.experimental.pallas import tpu as pltpu


def _round_up(x, m):
    return ((x + m - 1) // m) * m


def _pick_tile_n(h):
    """Column tile of the weight: full H when small, else the largest of
    {1024, 512, 256, 128} dividing H (lane-dense, 128-aligned tiles)."""
    if h <= 1024:
        return h
    for tn in (1024, 512, 256, 128):
        if h % tn == 0:
            return tn
    return h  # odd H: keep full width; row tile shrinks to fit VMEM


def _vmem_estimate(tr, tn, h):
    """Conservative per-core VMEM working set (double-buffered streams)."""
    return (2 * tr * h * 4        # x rows (f32)
            + 2 * tr * tn * 4     # out tile (f32)
            + 2 * h * tn * 2      # W column tile (bf16)
            + 2 * tn * 4          # bias tile
            + 2 * 2 * h * 4       # gamma + beta
            + tr * h * 2)         # normed scratch (bf16)


def _make_kernel(h, tn, eps):
    n_col_blocks = h // tn

    def kernel(x_ref, gamma_ref, beta_ref, w_ref, b_ref, o_ref, normed_ref):
        j = pl.program_id(1)

        # ---- LayerNorm once per row tile; reused across all column tiles ----
        @pl.when(j == 0)
        def _():
            x = x_ref[...].astype(jnp.float32)
            mean = jnp.mean(x, axis=-1, keepdims=True)
            centered = x - mean
            # torch.Tensor.std(): unbiased (N-1); module divides by (std + eps).
            var_unbiased = jnp.sum(centered * centered, axis=-1,
                                   keepdims=True) / (h - 1)
            std = jnp.sqrt(var_unbiased)
            normed = gamma_ref[...] * (centered / (std + eps)) + beta_ref[...]
            normed_ref[...] = normed.astype(normed_ref.dtype)

        # ---- sublayer: Linear(H -> H), column tile j.  MXU, f32 accumulate ----
        sub = jnp.dot(normed_ref[...], w_ref[...],
                      preferred_element_type=jnp.float32) + b_ref[...]

        # ---- dropout: eval-mode identity ----
        # TODO(synk): training-mode dropout (pltpu.prng_* mask) not implemented.

        # ---- residual add on the matching column slice of x ----
        if n_col_blocks == 1:
            x_cols = x_ref[...]
        else:
            col0 = pl.multiple_of(j * tn, tn)  # tn is a multiple of 128 here
            x_cols = x_ref[:, pl.ds(col0, tn)]
        o_ref[...] = (x_cols.astype(jnp.float32) + sub).astype(o_ref.dtype)

    return kernel


def residual_skip_connection_with_layernorm(x, gamma, beta, w, b, *,
                                            eps=1e-6,
                                            tile_rows=512,
                                            mxu_dtype=jnp.bfloat16):
    """x: (B, S, H).  Returns x + Linear(LayerNorm(x))  (dropout = eval)."""
    B, S, H = x.shape
    rows = B * S
    x2 = x.reshape(rows, H)            # metadata-only reshape; no HBM pad/copy

    tn = _pick_tile_n(H)

    # Row tile: multiple of 8, large by default (HBM-bound regime), shrunk to
    # fit the per-generation VMEM budget.
    tr = min(tile_rows, _round_up(rows, 8))
    tr = max(8, (tr // 8) * 8)

    vmem_cap = 64 << 20                # conservative (v7x) if query fails
    try:
        vmem_cap = int(pltpu.get_tpu_info().vmem_capacity_bytes)
    except Exception:
        pass
    budget = vmem_cap - (8 << 20)      # headroom for Mosaic internal scratch
    while _vmem_estimate(tr, tn, H) > budget and tr > 8:
        tr = max(8, ((tr // 2) // 8) * 8)

    vmem_est = _vmem_estimate(tr, tn, H)
    vmem_limit = None
    # v5e default scoped limit is 16 MiB (v6e/v7x: 32 MiB) -> raise it
    # explicitly whenever the working set approaches it, capped below the
    # physical VMEM of the current generation.
    if vmem_est > (14 << 20):
        vmem_limit = min(budget, int(vmem_est * 1.5))

    grid = (pl.cdiv(rows, tr), H // tn)

    w_c = w.astype(mxu_dtype)
    gamma2 = gamma.reshape(1, H).astype(jnp.float32)
    beta2 = beta.reshape(1, H).astype(jnp.float32)
    b2 = b.reshape(1, H).astype(jnp.float32)

    kernel = _make_kernel(H, tn, eps)

    call = pl.pallas_call(
        kernel,
        out_shape=jax.ShapeDtypeStruct((rows, H), x.dtype),
        grid_spec=pltpu.PrefetchScalarGridSpec(
            num_scalar_prefetch=0,
            grid=grid,
            in_specs=[
                pl.BlockSpec((tr, H), lambda i, j: (i, 0)),   # x rows (full H)
                pl.BlockSpec((1, H), lambda i, j: (0, 0)),    # gamma
                pl.BlockSpec((1, H), lambda i, j: (0, 0)),    # beta
                pl.BlockSpec((H, tn), lambda i, j: (0, j)),   # W column tile
                pl.BlockSpec((1, tn), lambda i, j: (0, j)),   # bias column tile
            ],
            out_specs=pl.BlockSpec((tr, tn), lambda i, j: (i, j)),
            scratch_shapes=[pltpu.VMEM((tr, H), mxu_dtype)],  # normed rows
        ),
        compiler_params=pltpu.CompilerParams(
            dimension_semantics=("parallel", "arbitrary"),
            vmem_limit_bytes=vmem_limit,
        ),
        cost_estimate=pl.CostEstimate(
            flops=2 * rows * H * H,
            transcendentals=2 * rows,
            bytes_accessed=2 * rows * H * 4 + H * H * 2 + 4 * H * 4,
        ),
    )

    out2 = call(x2, gamma2, beta2, w_c, b2)
    return out2.reshape(B, S, H)


def reference(x, gamma, beta, w, b):
    """Pure-JAX (f32) reference matching the PyTorch module semantics."""
    mean = jnp.mean(x, axis=-1, keepdims=True)
    centered = x - mean
    h = x.shape[-1]
    std = jnp.sqrt(jnp.sum(centered * centered, axis=-1, keepdims=True) / (h - 1))
    normed = gamma * centered / (std + 1e-6) + beta
    sub = normed @ w + b
    return x + sub


if __name__ == "__main__":
    B, S, H = 2, 8, 32
    key = jax.random.PRNGKey(0)
    kx, kw, kb = jax.random.split(key, 3)

    x = jax.random.normal(kx, (B, S, H), dtype=jnp.float32)

    # LayerNorm params as in __init__ (ones/zeros); sublayer Linear fixed seed.
    gamma = jnp.ones((H,), dtype=jnp.float32)
    beta = jnp.zeros((H,), dtype=jnp.float32)
    w = jax.random.normal(kw, (H, H), dtype=jnp.float32) * (1.0 / jnp.sqrt(H))
    b = jax.random.normal(kb, (H,), dtype=jnp.float32) * 0.02

    out = residual_skip_connection_with_layernorm(x, gamma, beta, w, b)
    out = jax.block_until_ready(out)

    ref = reference(x, gamma, beta, w, b)
    assert out.shape == (B, S, H)
    # bf16 MXU operands -> slightly looser tolerance vs the f32 reference.
    assert jnp.allclose(out, ref, atol=3e-2, rtol=3e-2), "mismatch vs reference"

    print("KERNEL_OK")
</pallas_src>

<mosaic_0001>
module attributes {stable_mosaic.version = 11 : i64} {
  func.func @kernel(%arg0: i32, %arg1: i32, %arg2: memref<16x32xf32, #tpu.memory_space<vmem>>, %arg3: memref<1x32xf32, #tpu.memory_space<vmem>>, %arg4: memref<1x32xf32, #tpu.memory_space<vmem>>, %arg5: memref<32x32xbf16, #tpu.memory_space<vmem>>, %arg6: memref<1x32xf32, #tpu.memory_space<vmem>>, %arg7: memref<16x32xf32, #tpu.memory_space<vmem>>, %arg8: memref<16x32xbf16, #tpu.memory_space<vmem>>) attributes {dimension_semantics = [#tpu.dimension_semantics<parallel>, #tpu.dimension_semantics<arbitrary>], iteration_bounds = array<i64: 1, 1>, scalar_prefetch = 0 : i64, scratch_operands = 1 : i64, tpu.core_type = #tpu.core_type<tc>, window_params = [{transform_indices = @transform_0, window_bounds = array<i64: 16, 32>}, {pipeline_mode = #tpu.pipeline_mode<synchronous>, transform_indices = @transform_1, window_bounds = array<i64: 1, 32>}, {pipeline_mode = #tpu.pipeline_mode<synchronous>, transform_indices = @transform_2, window_bounds = array<i64: 1, 32>}, {transform_indices = @transform_3, window_bounds = array<i64: 32, 32>}, {transform_indices = @transform_4, window_bounds = array<i64: 1, 32>}, {transform_indices = @transform_5, window_bounds = array<i64: 16, 32>}]} {
    %c0_i32 = arith.constant 0 : i32
    %0 = arith.cmpi eq, %arg1, %c0_i32 : i32
    %1 = arith.extui %0 : i1 to i32
    %c0_i32_0 = arith.constant 0 : i32
    %2 = arith.cmpi ne, %1, %c0_i32_0 : i32
    scf.if %2 {
      %c0_10 = arith.constant 0 : index
      %c0_11 = arith.constant 0 : index
      %12 = vector.load %arg2[%c0_10, %c0_11] : memref<16x32xf32, #tpu.memory_space<vmem>>, vector<16x32xf32>
      %cst_12 = arith.constant dense<0.000000e+00> : vector<16xf32>
      %13 = vector.multi_reduction <add>, %12, %cst_12 [1] : vector<16x32xf32> to vector<16xf32>
      %14 = vector.shape_cast %13 : vector<16xf32> to vector<16x1xf32>
      %cst_13 = arith.constant 3.200000e+01 : f32
      %15 = vector.broadcast %cst_13 : f32 to vector<16x1xf32>
      %16 = arith.divf %14, %15 : vector<16x1xf32>
      %17 = vector.broadcast %16 : vector<16x1xf32> to vector<16x32xf32>
      %18 = arith.subf %12, %17 : vector<16x32xf32>
      %19 = arith.mulf %18, %18 : vector<16x32xf32>
      %cst_14 = arith.constant dense<0.000000e+00> : vector<16xf32>
      %20 = vector.multi_reduction <add>, %19, %cst_14 [1] : vector<16x32xf32> to vector<16xf32>
      %21 = vector.shape_cast %20 : vector<16xf32> to vector<16x1xf32>
      %cst_15 = arith.constant 3.100000e+01 : f32
      %22 = vector.broadcast %cst_15 : f32 to vector<16x1xf32>
      %23 = arith.divf %21, %22 : vector<16x1xf32>
      %24 = math.sqrt %23 : vector<16x1xf32>
      %c0_16 = arith.constant 0 : index
      %c0_17 = arith.constant 0 : index
      %25 = vector.load %arg3[%c0_16, %c0_17] : memref<1x32xf32, #tpu.memory_space<vmem>>, vector<1x32xf32>
      %cst_18 = arith.constant 9.99999997E-7 : f32
      %26 = vector.broadcast %cst_18 : f32 to vector<16x1xf32>
      %27 = arith.addf %24, %26 : vector<16x1xf32>
      %28 = vector.broadcast %27 : vector<16x1xf32> to vector<16x32xf32>
      %29 = arith.divf %18, %28 : vector<16x32xf32>
      %30 = vector.broadcast %25 : vector<1x32xf32> to vector<16x32xf32>
      %31 = arith.mulf %30, %29 : vector<16x32xf32>
      %c0_19 = arith.constant 0 : index
      %c0_20 = arith.constant 0 : index
      %32 = vector.load %arg4[%c0_19, %c0_20] : memref<1x32xf32, #tpu.memory_space<vmem>>, vector<1x32xf32>
      %33 = vector.broadcast %32 : vector<1x32xf32> to vector<16x32xf32>
      %34 = arith.addf %31, %33 : vector<16x32xf32>
      %35 = arith.truncf %34 : vector<16x32xf32> to vector<16x32xbf16>
      %c0_21 = arith.constant 0 : index
      %c0_22 = arith.constant 0 : index
      %36 = vector.load %arg8[%c0_21, %c0_22] : memref<16x32xbf16, #tpu.memory_space<vmem>>, vector<16x32xbf16>
      tpu.vector_store %arg8[%c0_21, %c0_22], %35 {strides = array<i32>} : memref<16x32xbf16, #tpu.memory_space<vmem>>, vector<16x32xbf16>,
    } else {
    }
    %c0 = arith.constant 0 : index
    %c0_1 = arith.constant 0 : index
    %3 = vector.load %arg8[%c0, %c0_1] : memref<16x32xbf16, #tpu.memory_space<vmem>>, vector<16x32xbf16>
    %c0_2 = arith.constant 0 : index
    %c0_3 = arith.constant 0 : index
    %4 = vector.load %arg5[%c0_2, %c0_3] : memref<32x32xbf16, #tpu.memory_space<vmem>>, vector<32x32xbf16>
    %cst = arith.constant dense<0.000000e+00> : vector<16x32xf32>
    %5 = tpu.matmul %3, %4, %cst {dimension_numbers = #tpu.dot_dimension_numbers<[1], [0], [0], [1], [0, 0, 1, 1], [], []>} : vector<16x32xbf16>, vector<32x32xbf16>, vector<16x32xf32> -> vector<16x32xf32>
    %c0_4 = arith.constant 0 : index
    %c0_5 = arith.constant 0 : index
    %6 = vector.load %arg6[%c0_4, %c0_5] : memref<1x32xf32, #tpu.memory_space<vmem>>, vector<1x32xf32>
    %7 = vector.broadcast %6 : vector<1x32xf32> to vector<16x32xf32>
    %8 = arith.addf %5, %7 : vector<16x32xf32>
    %c0_6 = arith.constant 0 : index
    %c0_7 = arith.constant 0 : index
    %9 = vector.load %arg2[%c0_6, %c0_7] : memref<16x32xf32, #tpu.memory_space<vmem>>, vector<16x32xf32>
    %10 = arith.addf %9, %8 : vector<16x32xf32>
    %c0_8 = arith.constant 0 : index
    %c0_9 = arith.constant 0 : index
    %11 = vector.load %arg7[%c0_8, %c0_9] : memref<16x32xf32, #tpu.memory_space<vmem>>, vector<16x32xf32>
    tpu.vector_store %arg7[%c0_8, %c0_9], %10 {strides = array<i32>} : memref<16x32xf32, #tpu.memory_space<vmem>>, vector<16x32xf32>,
    return
  }
  func.func @transform_0(%arg0: i32, %arg1: i32) -> (i32, i32) {
    %c0_i32 = arith.constant 0 : i32
    %c0_i32_0 = arith.constant 0 : i32
    return %arg0, %c0_i32 : i32, i32
  }
  func.func @transform_1(%arg0: i32, %arg1: i32) -> (i32, i32) {
    %c0_i32 = arith.constant 0 : i32
    %c0_i32_0 = arith.constant 0 : i32
    %c0_i32_1 = arith.constant 0 : i32
    return %c0_i32, %c0_i32_0 : i32, i32
  }
  func.func @transform_2(%arg0: i32, %arg1: i32) -> (i32, i32) {
    %c0_i32 = arith.constant 0 : i32
    %c0_i32_0 = arith.constant 0 : i32
    %c0_i32_1 = arith.constant 0 : i32
    return %c0_i32, %c0_i32_0 : i32, i32
  }
  func.func @transform_3(%arg0: i32, %arg1: i32) -> (i32, i32) {
    %c0_i32 = arith.constant 0 : i32
    %c0_i32_0 = arith.constant 0 : i32
    return %c0_i32, %arg1 : i32, i32
  }
  func.func @transform_4(%arg0: i32, %arg1: i32) -> (i32, i32) {
    %c0_i32 = arith.constant 0 : i32
    %c0_i32_0 = arith.constant 0 : i32
    return %c0_i32, %arg1 : i32, i32
  }
  func.func @transform_5(%arg0: i32, %arg1: i32) -> (i32, i32) {
    %c0_i32 = arith.constant 0 : i32
    return %arg0, %arg1 : i32, i32
  }
}

</mosaic_0001>

<bundles_post_ra>
// kernel: tpu_custom_call.1
= control target key start
LH: loop header
LB: loop body
LE: loop exit
PB: predicated region body
PF: predicated region fallthrough
CT: control target
= control target key end

     0   :  { %10 = vsyncpa [#allocation4], 0  ;;  %s486_s0 = inlined_call_operand.hbm [shape: f32[16,32], index: 0, kind: input, shape index: {}]   ;;  %s487_s1 = inlined_call_operand.hbm [shape: f32[1,32], index: 1, kind: input, shape index: {}]   ;;  %s488_s2 = inlined_call_operand.vmem [shape: f32[1,32], index: 2, kind: input, shape index: {}]   ;;  %s489_s3 = inlined_call_operand.hbm [shape: bf16[32,32], index: 3, kind: input, shape index: {}]   ;;  %s490_s4 = inlined_call_operand.vmem [shape: f32[1,32], index: 4, kind: input, shape index: {}]   ;;  %s491_s5 = inlined_call_operand.hbm [shape: f32[16,32], index: 5, kind: output, shape index: {}]  }
   0x1   :  { %11 = vsyncpa [#allocation7], 0  ;;  %s31_s20 = sshll.u32 %s487_s1, 4  ;;  %s32_s20 = int_to_ptr.hbm [resolvable:$true] %s31_s20 }
   0x2   :  { %12 = vsyncpa [#allocation5], 0  ;;  %s395_s21 = smov [#allocation6]   ;;  %s17_s25 = sshll.u32 %s486_s0, 4  ;;  %s18_s25 = int_to_ptr.hbm [resolvable:$true] %s17_s25 }
   0x3   :  { %s33_s22 = sshll.u32 %s395_s21, 4  ;;  %s396_s26 = smov [#allocation3]   ;;  %s34_s22 = int_to_ptr.vmem [resolvable:$true] %s33_s22 }
   0x4   :  { %36 = dma.hbm_to_vmem [thread:$0]  %s32_s20, 16, %s34_s22, [#allocation7]  }
   0x5   :  { %s19_s27 = sshll.u32 %s396_s26, 4  ;;  %s397_s28 = smov 128   ;;  %s20_s27 = int_to_ptr.vmem [resolvable:$true] %s19_s27 }
   0x6   :  { %s398_s29 = smov 8   ;;  %s43_s6 = sshll.u32 %s489_s3, 4  ;;  %s44_s6 = int_to_ptr.hbm [resolvable:$true] %s43_s6 }
   0x7   :  { %25 = dma.hbm_to_vmem [thread:$0]  %s18_s25, 256, %s20_s27, [#allocation4], %s397_s28, %s397_s28, %s398_s29  }
   0x8   :  { %s399_s7 = smov [#allocation8]   ;;  %s400_s0 = smov 64  }
   0x9   :  { %s45_s8 = sshll.u32 %s399_s7, 4  ;;  %s401_s9 = smov 4   ;;  %s46_s8 = int_to_ptr.vmem [resolvable:$true] %s45_s8 }
   0xa   :  { %51 = dma.hbm_to_vmem [thread:$0]  %s44_s6, 256, %s46_s8, [#allocation7], %s400_s0, %s400_s0, %s401_s9  }
   0xb   :  { %389 = dma.done.wait [#allocation4], 256  }
   0xc   :  { %390 = vsyncadd [#allocation4], 4294967040 }
   0xd   :  { %391 = dma.done.wait [#allocation7], 272  }
   0xe   :  { %392 = vsyncadd [#allocation7], 4294967024  ;;  %vm73_vm0 = vcmask 261120   ;;  %v447_v0 = vld [vmem:[#allocation3] sm:$0xff]  ;;  %v451_v2 = vld [vmem:[#allocation3 + $0x8] sm:$0xff]  ;;  %v402_v4 = vmov 32.0  }
   0xf   :  { %v74_v1 = vsel %vm73_vm0, %v447_v0, 0.0  ;;  %v77_v3 = vsel %vm73_vm0, %v451_v2, 0.0  ;;  %281 = vrcp.f32 %v402_v4  ;;  %v403_v21 = vmov 31.0   ;;  %v267_v42 = vld [vmem:[#allocation8 + $0x8] sm:$0xff]  ;;  %v266_v46 = vld [vmem:[#allocation8] sm:$0xff]  ;;  %s404_s12 = smov [#allocation9]  }
  0x10   :  { %75 = vadd.xlane.f32.xlu0 %v74_v1  ;;  %283 = vrcp.f32 %v403_v21  ;;  %218 = vmatpush.bf16.msra.mxu0 %v267_v42  ;;  %v278_v4 = vld [vmem:[#allocation6] ss:$0 sm:$0xff]  ;;  %vm178_vm13 = vcmask 257024   ;;  %s236_s13 = sshll.u32 %s404_s12, 4  ;;  %s238_s16 = sshll.u32 %s491_s5, 4  ;;  %s237_s13 = int_to_ptr.vmem [resolvable:$true] %s236_s13  ;;  %s239_s16 = int_to_ptr.hbm [resolvable:$true] %s238_s16 }
  0x14   :  { %219 = vmatpush.bf16.msra.mxu0 %v266_v46 }
  0x15   :  { %v282_v5 = vpop.eup %281 }
  0x16   :  { %v81_v6 = vmul.f32 32.0, %v282_v5  ;;  %vm85_vm1 = vweird.f32 %v282_v5  ;;  %v284_v22 = vpop.eup %283 }
  0x17   :  { %v100_v23 = vmul.f32 31.0, %v284_v22  ;;  %vm104_vm2 = vweird.f32 %v284_v22 }
  0x18   :  { %78 = vadd.xlane.f32.xlu0 %v77_v3  ;;  %v82_v7 = vsub.f32 1.0, %v81_v6 }
  0x19   :  { %v101_v24 = vsub.f32 1.0, %v100_v23 }
  0x1a   :  { %v83_v8 = vmul.f32 %v282_v5, %v82_v7 }
  0x1b   :  { %v102_v25 = vmul.f32 %v284_v22, %v101_v24 }
  0x1c   :  { %v84_v9 = vadd.f32 %v282_v5, %v83_v8  ;;  %v279_v8 = vld [vmem:[%s488_s2] ss:$0 sm:$0xff] }
  0x1d   :  { %v103_v26 = vadd.f32 %v284_v22, %v102_v25 }
  0x1e   :  { %v86_v10 = vsel %vm85_vm1, %v282_v5, %v84_v9 }
  0x1f   :  { %v105_v27 = vsel %vm104_vm2, %v284_v22, %v103_v26  ;;  %v280_v26 = vld [vmem:[%s490_s4] ss:$0 sm:$0xff] }
  0x83   :  { %v76_v11 = vpop.xlane.xlu0 %75 }
  0x84   :  { %v87_v12 = vmul.f32 %v86_v10, %v76_v11 }
  0x86   :  { %v456_v13 = vsub.f32 %v447_v0, %v87_v12 }
  0x88   :  { %v91_v14 = vmul.f32 %v456_v13, %v456_v13 }
  0x8a   :  { %v93_v15 = vsel %vm73_vm0, %v91_v14, 0.0 }
  0x8b   :  { %94 = vadd.xlane.f32.xlu1 %v93_v15  ;;  %v79_v16 = vpop.xlane.xlu0 %78 }
  0x8c   :  { %v88_v17 = vmul.f32 %v86_v10, %v79_v16 }
  0x8e   :  { %v462_v18 = vsub.f32 %v451_v2, %v88_v17 }
  0x90   :  { %v92_v19 = vmul.f32 %v462_v18, %v462_v18 }
  0x92   :  { %v96_v20 = vsel %vm73_vm0, %v92_v19, 0.0 }
  0x93   :  { %97 = vadd.xlane.f32.xlu1 %v96_v20 }
  0xfe   :  { %v95_v28 = vpop.xlane.xlu1 %94 }
  0xff   :  { %v106_v29 = vmul.f32 %v105_v27, %v95_v28 }
 0x101   :  { %285 = vrsqrt.f32 %v106_v29  ;;  %vm115_vm3 = vcmp.eq.f32.partialorder %v106_v29, inf  ;;  %v118_v43 = vand.u32 2147483648, %v106_v29  ;;  %vm117_vm4 = vcmp.eq.f32.partialorder %v106_v29, 0.0 }
 0x106   :  { %v98_v30 = vpop.xlane.xlu1 %97 }
 0x107   :  { %v286_v31 = vpop.eup %285  ;;  %v107_v32 = vmul.f32 %v105_v27, %v98_v30 }
 0x108   :  { %v109_v33 = vmul.f32 %v286_v31, %v106_v29 }
 0x109   :  { %287 = vrsqrt.f32 %v107_v32  ;;  %vm127_vm5 = vcmp.eq.f32.partialorder %v107_v32, inf  ;;  %v130_v52 = vand.u32 2147483648, %v107_v32  ;;  %vm129_vm6 = vcmp.eq.f32.partialorder %v107_v32, 0.0 }
 0x10a   :  { %v110_v34 = vmul.f32 %v286_v31, %v109_v33 }
 0x10c   :  { %v111_v35 = vmul.f32 0.5, %v110_v34 }
 0x10e   :  { %v112_v36 = vsub.f32 1.5, %v111_v35 }
 0x10f   :  { %v288_v37 = vpop.eup %287 }
 0x110   :  { %v113_v38 = vmul.f32 %v286_v31, %v112_v36  ;;  %v121_v39 = vmul.f32 %v288_v37, %v107_v32 }
 0x112   :  { %v114_v40 = vmul.f32 %v113_v38, %v106_v29  ;;  %v122_v41 = vmul.f32 %v288_v37, %v121_v39 }
 0x114   :  { %v116_v44 = vsel %vm115_vm3, %v106_v29, %v114_v40  ;;  %v123_v45 = vmul.f32 0.5, %v122_v41 }
 0x115   :  { %v119_v47 = vsel %vm117_vm4, %v118_v43, %v116_v44 }
 0x116   :  { %v133_v48 = vadd.f32 1e-06, %v119_v47  ;;  %v124_v49 = vsub.f32 1.5, %v123_v45 }
 0x118   :  { %289 = vrcp.f32 %v133_v48  ;;  %v125_v50 = vmul.f32 %v288_v37, %v124_v49  ;;  %v146_v59 = vand.u32 2147483648, %v133_v48  ;;  %v144_v61 = vand.u32 2147483647, %v133_v48 }
 0x119   :  { %vm140_vm8 = vweird.f32 %v133_v48 }
 0x11a   :  { %v126_v51 = vmul.f32 %v125_v50, %v107_v32  ;;  %v147_v63 = vor.u32 1.1754944e-38, %v146_v59  ;;  %vm145_vm10 = vcmp.eq.f32.partialorder %v144_v61, 8.507059e+37 }
 0x11c   :  { %v128_v53 = vsel %vm127_vm5, %v107_v32, %v126_v51 }
 0x11d   :  { %v131_v55 = vsel %vm129_vm6, %v130_v52, %v128_v53 }
 0x11e   :  { %v290_v54 = vpop.eup %289  ;;  %v134_v57 = vadd.f32 1e-06, %v131_v55 }
 0x11f   :  { %v136_v56 = vmul.f32 %v290_v54, %v133_v48  ;;  %vm141_vm7 = vweird.f32 %v290_v54 }
 0x120   :  { %291 = vrcp.f32 %v134_v57  ;;  %vm142_vm9 = vmor %vm140_vm8, %vm141_vm7  ;;  %v161_v10 = vand.u32 2147483648, %v134_v57  ;;  %v159_v14 = vand.u32 2147483647, %v134_v57  ;;  %vm155_vm12 = vweird.f32 %v134_v57 }
 0x121   :  { %v137_v58 = vsub.f32 1.0, %v136_v56 }
 0x122   :  { %v162_v17 = vor.u32 1.1754944e-38, %v161_v10  ;;  %vm160_vm15 = vcmp.eq.f32.partialorder %v159_v14, 8.507059e+37 }
 0x123   :  { %v138_v60 = vmul.f32 %v290_v54, %v137_v58 }
 0x125   :  { %v139_v62 = vadd.f32 %v290_v54, %v138_v60 }
 0x126   :  { %v292_v1 = vpop.eup %291 }
 0x127   :  { %v143_v3 = vsel %vm142_vm9, %v290_v54, %v139_v62  ;;  %v151_v6 = vmul.f32 %v292_v1, %v134_v57  ;;  %vm156_vm11 = vweird.f32 %v292_v1 }
 0x128   :  { %v148_v5 = vsel %vm145_vm10, %v147_v63, %v143_v3  ;;  %vm157_vm14 = vmor %vm155_vm12, %vm156_vm11 }
 0x129   :  { %v149_v7 = vmul.f32 %v148_v5, %v456_v13  ;;  %v152_v9 = vsub.f32 1.0, %v151_v6 }
 0x12b   :  { %v168_v11 = vmul.f32 %v278_v4, %v149_v7  ;;  %v153_v12 = vmul.f32 %v292_v1, %v152_v9 }
 0x12d   :  { %v174_v15 = vadd.f32 %v279_v8, %v168_v11  ;;  %v154_v16 = vadd.f32 %v292_v1, %v153_v12 }
 0x12f   :  { %v176_v19 = vpack.c.bf16 %v174_v15, %v174_v15  ;;  %v158_v20 = vsel %vm157_vm14, %v292_v1, %v154_v16 }
 0x130   :  { %v163_v13 = vsel %vm160_vm15, %v162_v17, %v158_v20 }
 0x131   :  { %179 = vst.msk [vmem:[#allocation2] sm:$0xf] %vm178_vm13, %v176_v19  ;;  %v164_v21 = vmul.f32 %v163_v13, %v462_v18 }
 0x133   :  { %v169_v22 = vmul.f32 %v278_v4, %v164_v21 }
 0x135   :  { %v175_v23 = vadd.f32 %v279_v8, %v169_v22 }
 0x137   :  { %v177_v24 = vpack.c.bf16 %v175_v23, %v175_v23 }
 0x139   :  { %180 = vst.msk [vmem:[#allocation2 + $0x4] sm:$0xf] %vm178_vm13, %v177_v24 }
 0x140   :  { %v265_v25 = vld [vmem:[#allocation2] sm:$0xff] }
 0x141   :  { %264 = vmatmul.msk.bf16.vlgmr.msra.gmra.mxu0 %vm73_vm0, %v265_v25 }
 0x1be   :  { %v221_v27 = vpop.f32.mrf.mxu0 }
 0x1bf   :  { %v222_v28 = vadd.f32 %v280_v26, %v221_v27 }
 0x1c1   :  { %v228_v29 = vadd.f32 %v222_v28, %v447_v0 }
 0x1c3   :  { %230 = vst.msk [vmem:[#allocation9] sm:$0xff] %vm73_vm0, %v228_v29 }
 0x1c6   :  { %v223_v30 = vpop.f32.mrf.mxu0 }
 0x1c7   :  { %v224_v18 = vadd.f32 %v280_v26, %v223_v30 }
 0x1c9   :  { %v229_v31 = vadd.f32 %v224_v18, %v451_v2 }
 0x1cb   :  { %231 = vst.msk [vmem:[#allocation9 + $0x8] sm:$0xff] %vm73_vm0, %v229_v31 }
 0x1cc   :  { %244 = dma.vmem_to_hbm [thread:$0]  %s237_s13, 256, %s239_s16, [#allocation5], %s397_s28, %s397_s28, %s398_s29  }
 0x1cd   :  { %393 = dma.done.wait [#allocation5], 256  }
 0x1ce   :  { %394 = vsyncadd [#allocation5], 4294967040 }
 0x1cf   :  { %249 = vsyncpa [#allocation4], 1 }
 0x1d0   :  { %250 = vsyncpa [#allocation7], 1 }
 0x1d1   :  { %251 = vsyncpa [#allocation5], 1 }

</bundles_post_ra>
